<compile_context>
chip_gen: v6e
topology: v6e:2x2x1
jax: 0.10.0
libtpu: 0.0.40
codegen_flags: <defaults>
</compile_context>

<pallas_src>
import jax
import jax.numpy as jnp
from jax.experimental import pallas as pl
from jax.experimental.pallas import tpu as pltpu


def _round_up(x, m):
    return ((x + m - 1) // m) * m


def _vmem_capacity_bytes():
    try:
        info = pltpu.get_tpu_info()
        cap = getattr(info, "vmem_capacity_bytes", None)
        if cap:
            return int(cap)
    except Exception:
        pass
    # Conservative fallback (v7x size) so tiles are always safe if the query fails.
    return 64 * 1024 * 1024


def _choose_tiles(M, K, V, in_itemsize, out_itemsize, budget):
    """Pick (tm, tk, tn, ksplit).

    Keeps the weight-read-once property (tk == K) whenever the full-K working
    set fits the VMEM budget; only splits K with a clean 128-multiple divisor
    (so K edge blocks can never pollute the accumulation).
    """
    tm = min(512, M)  # full-dim block when M < 512 (always layout-legal)

    def wset(tk, tn, ksplit):
        s = 2 * tm * tk * in_itemsize        # x tile, double-buffered
        s += 2 * tk * tn * in_itemsize       # weight tile, double-buffered
        s += 2 * tn * 4                      # bias tile (f32)
        s += 2 * tm * tn * out_itemsize      # output tile, double-buffered
        if ksplit:
            s += tm * tn * 4                 # f32 accumulator scratch
        return s

    # 1) Single full-V block: weight and activations each read exactly once.
    if wset(K, V, False) <= budget:
        return tm, K, V, False

    # 2) Full-K, 128-multiple vocab tiles (weight still read exactly once;
    #    activations re-streamed once per vocab tile).
    tn0 = max(128, min(4096, (V // 128) * 128))
    tn = tn0
    while tn > 512 and wset(K, tn, False) > budget:
        tn -= 128
    if wset(K, tn, False) <= budget:
        return tm, K, tn, False

    # 3) K too large for full-K tiles: split K on a clean 128-multiple divisor
    #    so tn can stay large (important on v7x's 64 MiB VMEM).
    tk = None
    for cand in range(1024, 127, -128):
        if K % cand == 0:
            tk = cand
            break
    if tk is not None and tk < K:
        tn = tn0
        while tn > 512 and wset(tk, tn, True) > budget:
            tn -= 128
        if wset(tk, tn, True) <= budget:
            return tm, tk, tn, True

    # 4) Last resort: keep full K, shrink tn to the floor.
    tn = tn0
    while tn > 128 and wset(K, tn, False) > budget:
        tn -= 128
    return tm, K, tn, False


def _linear_kernel(x_ref, w_ref, b_ref, o_ref):
    # x_ref: (tm, K)   w_ref: (K, tn) pre-transposed  b_ref: (1, tn) f32
    acc = jnp.dot(x_ref[...], w_ref[...], preferred_element_type=jnp.float32)
    o_ref[...] = (acc + b_ref[...]).astype(o_ref.dtype)


def _linear_kernel_ksplit(x_ref, w_ref, b_ref, o_ref, acc_ref):
    # Same contraction, K tiled on the innermost ("arbitrary") grid axis with
    # an f32 VMEM accumulator resident across it.
    k = pl.program_id(2)

    @pl.when(k == 0)
    def _():
        acc_ref[...] = jnp.zeros_like(acc_ref)

    acc_ref[...] += jnp.dot(x_ref[...], w_ref[...],
                            preferred_element_type=jnp.float32)

    @pl.when(k == pl.num_programs(2) - 1)
    def _():
        o_ref[...] = (acc_ref[...] + b_ref[...]).astype(o_ref.dtype)


def prepare_generator_params(weight, bias, *, compute_dtype=jnp.bfloat16):
    """One-time parameter prep for the generator projection.

    weight: [vocab, d_model] (PyTorch nn.Linear layout), bias: [vocab].
    Returns (w_kv, b_2d):
      w_kv  [d_model, vocab] -- pre-transposed (clean MXU RHS, no per-tile XLU
            transpose) and cast ONCE to compute_dtype (bf16 default: native MXU
            throughput, half the weight HBM streaming, no per-call cast pass).
      b_2d  [1, vocab] f32 (bias add stays f32 in-kernel).
    """
    w_kv = jnp.asarray(weight).T.astype(compute_dtype)
    b_2d = jnp.asarray(bias).astype(jnp.float32).reshape(1, -1)
    return w_kv, b_2d


def generator_forward(x, w_kv, b_2d, *, tm=None, tn=None, out_dtype=None,
                      weight_buffer_count=2):
    """y = x @ W^T + b with W stored pre-transposed/bf16 by prepare_generator_params.

    x: [B, S, d_model]; w_kv: [d_model, vocab]; b_2d: [1, vocab] f32.
    Returns [B, S, vocab] in out_dtype (default: x.dtype; pass jnp.bfloat16 to
    halve the logits write at training shapes).
    """
    B, S, K = x.shape
    K2, V = w_kv.shape
    assert K == K2, "w_kv must be [d_model, vocab] (use prepare_generator_params)"
    M = B * S
    out_dtype = x.dtype if out_dtype is None else out_dtype

    compute_dtype = w_kv.dtype
    x2 = x.reshape(M, K).astype(compute_dtype)   # activations: small vs weight

    in_itemsize = jnp.dtype(compute_dtype).itemsize
    out_itemsize = jnp.dtype(out_dtype).itemsize

    vmem_cap = _vmem_capacity_bytes()
    budget = int(vmem_cap * 0.65)        # tile working-set budget
    vmem_limit = int(vmem_cap * 0.75)    # scoped-VMEM limit handed to Mosaic

    tm_d, tk, tn_d, ksplit = _choose_tiles(M, K, V, in_itemsize, out_itemsize,
                                           budget)
    if tm is not None:
        tm_d = M if tm >= M else max(8, (tm // 8) * 8)
    if tn is not None:
        tn_d = V if tn >= V else max(128, (tn // 128) * 128)
    tm, tn = tm_d, tn_d

    ni = pl.cdiv(M, tm)
    nj = pl.cdiv(V, tn)
    nk = pl.cdiv(K, tk)

    # Optional deeper weight pipelining to hide the per-vocab-tile weight DMA.
    w_kwargs = {}
    if weight_buffer_count and weight_buffer_count > 2:
        w_kwargs["pipeline_mode"] = pl.Buffered(weight_buffer_count)

    weight_passes = ni if ksplit else 1
    cost = pl.CostEstimate(
        flops=2 * M * K * V,
        transcendentals=0,
        bytes_accessed=(weight_passes * V * K + nj * M * K) * in_itemsize
        + M * V * out_itemsize + V * 4,
    )

    if not ksplit:
        grid = (nj, ni)  # vocab tiles OUTER -> each weight slab fetched once
        in_specs = [
            pl.BlockSpec((tm, K), lambda j, i: (i, 0)),              # activations
            pl.BlockSpec((K, tn), lambda j, i: (0, j), **w_kwargs),  # weight [K,V]
            pl.BlockSpec((1, tn), lambda j, i: (0, j)),              # bias (f32)
        ]
        out_spec = pl.BlockSpec((tm, tn), lambda j, i: (i, j))
        scratch = []
        kernel = _linear_kernel
        # vocab axis "parallel" (v7x megacore split keeps weight-read-once),
        # row axis "arbitrary".
        dims = ("parallel", "arbitrary")
    else:
        grid = (nj, ni, nk)
        in_specs = [
            pl.BlockSpec((tm, tk), lambda j, i, k: (i, k)),
            pl.BlockSpec((tk, tn), lambda j, i, k: (k, j), **w_kwargs),
            pl.BlockSpec((1, tn), lambda j, i, k: (0, j)),
        ]
        out_spec = pl.BlockSpec((tm, tn), lambda j, i, k: (i, j))
        scratch = [pltpu.VMEM((tm, tn), jnp.float32)]
        kernel = _linear_kernel_ksplit
        dims = ("parallel", "arbitrary", "arbitrary")

    out = pl.pallas_call(
        kernel,
        out_shape=jax.ShapeDtypeStruct((M, V), out_dtype),
        grid_spec=pltpu.PrefetchScalarGridSpec(
            num_scalar_prefetch=0,
            grid=grid,
            in_specs=in_specs,
            out_specs=out_spec,
            scratch_shapes=scratch,
        ),
        compiler_params=pltpu.CompilerParams(
            dimension_semantics=dims,
            vmem_limit_bytes=vmem_limit,
        ),
        cost_estimate=cost,
    )(x2, w_kv, b_2d)

    return out.reshape(B, S, V)


if __name__ == "__main__":
    # Small shapes consistent with the module: d_model=32, vocab=64.
    B, S, D_MODEL, VOCAB = 2, 8, 32, 64

    key = jax.random.PRNGKey(0)
    kx, kw, kb = jax.random.split(key, 3)

    x = jax.random.normal(kx, (B, S, D_MODEL), dtype=jnp.float32)
    # nn.Linear(d_model, vocab)-style parameters: W [vocab, d_model], b [vocab].
    weight = jax.random.normal(kw, (VOCAB, D_MODEL), dtype=jnp.float32) * (1.0 / D_MODEL ** 0.5)
    bias = jax.random.normal(kb, (VOCAB,), dtype=jnp.float32) * 0.01

    y_ref = jnp.einsum("bsd,vd->bsv", x, weight) + bias

    # Default path: persistent bf16 weight, pre-transposed once at "load" time.
    w_kv, b_2d = prepare_generator_params(weight, bias)
    y = generator_forward(x, w_kv, b_2d)
    jax.block_until_ready(y)
    assert y.shape == (B, S, VOCAB)
    assert y.dtype == x.dtype
    assert jnp.allclose(y, y_ref, atol=5e-2, rtol=5e-2)

    # f32-streaming path (accumulation is f32 in both; looser-than-exact tol
    # because the MXU may run f32 dots as multi-pass bf16 under DEFAULT precision).
    w_kv32, b32 = prepare_generator_params(weight, bias, compute_dtype=jnp.float32)
    y32 = generator_forward(x, w_kv32, b32)
    jax.block_until_ready(y32)
    assert jnp.allclose(y32, y_ref, atol=1e-3, rtol=1e-3)

    print("KERNEL_OK")
</pallas_src>

<mosaic_0001>
module attributes {stable_mosaic.version = 11 : i64} {
  func.func @_linear_kernel(%arg0: i32, %arg1: i32, %arg2: memref<16x32xbf16, #tpu.memory_space<vmem>>, %arg3: memref<32x64xbf16, #tpu.memory_space<vmem>>, %arg4: memref<1x64xf32, #tpu.memory_space<vmem>>, %arg5: memref<16x64xf32, #tpu.memory_space<vmem>>) attributes {dimension_semantics = [#tpu.dimension_semantics<parallel>, #tpu.dimension_semantics<arbitrary>], iteration_bounds = array<i64: 1, 1>, scalar_prefetch = 0 : i64, scratch_operands = 0 : i64, tpu.core_type = #tpu.core_type<tc>, window_params = [{transform_indices = @transform_0, window_bounds = array<i64: 16, 32>}, {transform_indices = @transform_1, window_bounds = array<i64: 32, 64>}, {transform_indices = @transform_2, window_bounds = array<i64: 1, 64>}, {transform_indices = @transform_3, window_bounds = array<i64: 16, 64>}]} {
    %c0 = arith.constant 0 : index
    %c0_0 = arith.constant 0 : index
    %0 = vector.load %arg2[%c0, %c0_0] : memref<16x32xbf16, #tpu.memory_space<vmem>>, vector<16x32xbf16>
    %c0_1 = arith.constant 0 : index
    %c0_2 = arith.constant 0 : index
    %1 = vector.load %arg3[%c0_1, %c0_2] : memref<32x64xbf16, #tpu.memory_space<vmem>>, vector<32x64xbf16>
    %cst = arith.constant dense<0.000000e+00> : vector<16x64xf32>
    %2 = tpu.matmul %0, %1, %cst {dimension_numbers = #tpu.dot_dimension_numbers<[1], [0], [0], [1], [0, 0, 1, 1], [], []>} : vector<16x32xbf16>, vector<32x64xbf16>, vector<16x64xf32> -> vector<16x64xf32>
    %c0_3 = arith.constant 0 : index
    %c0_4 = arith.constant 0 : index
    %3 = vector.load %arg4[%c0_3, %c0_4] : memref<1x64xf32, #tpu.memory_space<vmem>>, vector<1x64xf32>
    %4 = vector.broadcast %3 : vector<1x64xf32> to vector<16x64xf32>
    %5 = arith.addf %2, %4 : vector<16x64xf32>
    %c0_5 = arith.constant 0 : index
    %c0_6 = arith.constant 0 : index
    %6 = vector.load %arg5[%c0_5, %c0_6] : memref<16x64xf32, #tpu.memory_space<vmem>>, vector<16x64xf32>
    tpu.vector_store %arg5[%c0_5, %c0_6], %5 {strides = array<i32>} : memref<16x64xf32, #tpu.memory_space<vmem>>, vector<16x64xf32>,
    return
  }
  func.func @transform_0(%arg0: i32, %arg1: i32) -> (i32, i32) {
    %c0_i32 = arith.constant 0 : i32
    %c0_i32_0 = arith.constant 0 : i32
    return %arg1, %c0_i32 : i32, i32
  }
  func.func @transform_1(%arg0: i32, %arg1: i32) -> (i32, i32) {
    %c0_i32 = arith.constant 0 : i32
    %c0_i32_0 = arith.constant 0 : i32
    return %c0_i32, %arg0 : i32, i32
  }
  func.func @transform_2(%arg0: i32, %arg1: i32) -> (i32, i32) {
    %c0_i32 = arith.constant 0 : i32
    %c0_i32_0 = arith.constant 0 : i32
    return %c0_i32, %arg0 : i32, i32
  }
  func.func @transform_3(%arg0: i32, %arg1: i32) -> (i32, i32) {
    %c0_i32 = arith.constant 0 : i32
    return %arg1, %arg0 : i32, i32
  }
}

</mosaic_0001>

<bundles_post_ra>
// kernel: tpu_custom_call.1
= control target key start
LH: loop header
LB: loop body
LE: loop exit
PB: predicated region body
PF: predicated region fallthrough
CT: control target
= control target key end

     0   :  { %8 = vsyncpa [#allocation3], 0  ;;  %s275_s0 = inlined_call_operand.hbm [shape: bf16[16,32], index: 0, kind: input, shape index: {}]   ;;  %s276_s1 = inlined_call_operand.hbm [shape: bf16[32,64], index: 1, kind: input, shape index: {}]   ;;  %s277_s2 = inlined_call_operand.vmem [shape: f32[1,64], index: 2, kind: input, shape index: {}]   ;;  %s278_s3 = inlined_call_operand.hbm [shape: f32[16,64], index: 3, kind: output, shape index: {}]  }
   0x1   :  { %9 = vsyncpa [#allocation6], 0 }
   0x2   :  { %10 = vsyncpa [#allocation4], 0  ;;  %s234_s12 = smov [#allocation2]  }
   0x3   :  { %s16_s13 = sshll.u32 %s234_s12, 4  ;;  %s17_s13 = int_to_ptr.vmem [resolvable:$true] %s16_s13 }
   0x4   :  { %s176_s14 = scalar_lea.vmem %s17_s13, 128  ;;  %p181_p1 = scmp.lt.s32.totalorder %s17_s13, %s17_s13 }
   0x5   :  { %p177_p0 = scmp.ne.s32.totalorder %s17_s13, %s176_s14  ;;  %p182_p2 = scmp.lt.s32.totalorder %s176_s14, %s176_s14 }
   0x7   :  { %p183_p3 = por %p182_p2, %p181_p1 }
   0x9   :  { %p184_p4 = pnand %p183_p3, %p177_p0 }
   0xb   :  { %187 = shalt.err (!%p184_p4)
}
   0xc   :  { %s235_s15 = smov 64   ;;  %s236_s16 = smov 4  }
   0xd   :  { %22 = dma.hbm_to_vmem [thread:$0]  %s275_s0, 128, %s17_s13, [#allocation3], %s235_s15, %s235_s15, %s236_s16  }
   0xe   :  { %s237_s19 = smov [#allocation5]  }
   0xf   :  { %s28_s20 = sshll.u32 %s237_s19, 4  ;;  %s29_s20 = int_to_ptr.vmem [resolvable:$true] %s28_s20 }
  0x10   :  { %s196_s21 = scalar_lea.vmem %s29_s20, 256  ;;  %p201_p6 = scmp.lt.s32.totalorder %s29_s20, %s29_s20 }
  0x11   :  { %p197_p5 = scmp.ne.s32.totalorder %s29_s20, %s196_s21  ;;  %p202_p7 = scmp.lt.s32.totalorder %s196_s21, %s196_s21 }
  0x13   :  { %p203_p8 = por %p202_p7, %p201_p6 }
  0x15   :  { %p204_p9 = pnand %p203_p8, %p197_p5 }
  0x17   :  { %207 = shalt.err (!%p204_p9)
}
  0x18   :  { %34 = dma.hbm_to_vmem [thread:$0]  %s276_s1, 256, %s29_s20, [#allocation6], %s235_s15, %s235_s15, %s236_s16  }
  0x19   :  { %228 = dma.done.wait [#allocation3], 128  }
  0x1a   :  { %229 = vsyncadd [#allocation3], 4294967168 }
  0x1b   :  { %230 = dma.done.wait [#allocation6], 256  }
  0x1c   :  { %231 = vsyncadd [#allocation6], 4294967040  ;;  %v238_v0 = vmov 0.0   ;;  %vm239_vm0 = vmmov 0   ;;  %v165_v1 = vld [vmem:[#allocation5 + $0x8] sm:$0xff]   ;;  %v166_v2 = vld [vmem:[#allocation5] sm:$0xff]  }
  0x1d   :  { %148 = vmatprep.subr.bf16.mxu0 %v238_v0  ;;  %152 = vmatprep.mubr.msk.bf16.mxu0 %vm239_vm0, %v238_v0  ;;  %v167_v3 = vld [vmem:[#allocation2] sm:$0xff]   ;;  %vm74_vm1 = vcmask 261120   ;;  %vm119_vm2 = vcmask 523264   ;;  %s240_s1 = smov [#allocation7]  }
  0x1e   :  { %149 = vmatpush3.bf16.msra.mxu0 %v165_v1  ;;  %v140_v4 = vld [vmem:[%s277_s2] ss:$0 sm:$0xff]  ;;  %s127_s25 = sshll.u32 %s240_s1, 4  ;;  %s128_s25 = int_to_ptr.vmem [resolvable:$true] %s127_s25 }
  0x1f   :  { %150 = vmatprep.subr.bf16.mxu0 %v238_v0  ;;  %s208_s26 = scalar_lea.vmem %s128_s25, 256  ;;  %p213_p11 = scmp.lt.s32.totalorder %s128_s25, %s128_s25 }
  0x20   :  { %p209_p10 = scmp.ne.s32.totalorder %s128_s25, %s208_s26  ;;  %p214_p12 = scmp.lt.s32.totalorder %s208_s26, %s208_s26 }
  0x22   :  { %151 = vmatpush3.bf16.msra.mxu0 %v166_v2  ;;  %p215_p13 = por %p214_p12, %p213_p11 }
  0x24   :  { %p216_p0 = pnand %p215_p13, %p209_p10 }
  0x25   :  { %153 = vmatmul.mubr.msk.bf16.vlgmr.msra.gmra.mxu0 %vm74_vm1, %v167_v3 }
  0xe5   :  { %v112_v5 = vpop.f32.mrf.mxu0 }
  0xe6   :  { %v113_v6 = vadd.f32 %v140_v4, %v112_v5 }
  0xe7   :  { %v154_v7 = vpop.f32.mrf.mxu0 }
  0xe8   :  { %120 = vst.msk [vmem:[#allocation7] sm:$0xff] %vm119_vm2, %v113_v6 }
  0xe9   :  { %v115_v8 = vpop.f32.mrf.mxu0 }
  0xea   :  { %v116_v9 = vadd.f32 %v140_v4, %v115_v8 }
  0xeb   :  { %v155_v10 = vpop.f32.mrf.mxu0 }
  0xec   :  { %121 = vst.msk [vmem:[#allocation7 + $0x8] sm:$0xff] %vm119_vm2, %v116_v9 }
  0xed   :  { %219 = shalt.err (!%p216_p0)
}
  0xee   :  { %s241_s2 = smov 128   ;;  %s242_s27 = smov 8  }
  0xef   :  { %133 = dma.vmem_to_hbm [thread:$0]  %s128_s25, 256, %s278_s3, [#allocation4], %s241_s2, %s241_s2, %s242_s27  }
  0xf0   :  { %232 = dma.done.wait [#allocation4], 256  }
  0xf1   :  { %233 = vsyncadd [#allocation4], 4294967040 }
  0xf2   :  { %137 = vsyncpa [#allocation3], 1 }
  0xf3   :  { %138 = vsyncpa [#allocation6], 1 }
  0xf4   :  { %139 = vsyncpa [#allocation4], 1 }

</bundles_post_ra>
